<compile_context>
chip_gen: v7x
topology: tpu7x:2x2x1
jax: 0.10.0
libtpu: 0.0.40
codegen_flags: <defaults>
</compile_context>

<pallas_src>
import jax
import jax.numpy as jnp
from jax.experimental import pallas as pl
from jax.experimental.pallas import tpu as pltpu

_LANE = 128  # TPU lane width


def _round_up(x, m):
    return ((x + m - 1) // m) * m


def _softplus(x):
    # Numerically stable softplus: log(1 + exp(x)) = max(x, 0) + log1p(exp(-|x|))
    return jnp.maximum(x, 0.0) + jnp.log1p(jnp.exp(-jnp.abs(x)))


def _make_policy_kernel(num_hidden, action_dim, compute_dtype):
    """Kernel for `num_hidden` [Linear->ReLU] layers + fused mu/std head.

    Transposed layout: activations are (features, tile_b); batch lives on lanes.
    Ref order: x_t, (w_i, b_i) * num_hidden, w_head, b_head, out.
    """

    def kernel(*refs):
        x_ref = refs[0]
        w_head_ref = refs[1 + 2 * num_hidden]
        b_head_ref = refs[2 + 2 * num_hidden]
        out_ref = refs[-1]

        h = x_ref[...]  # (state_dim, tile_b), already in compute dtype
        for i in range(num_hidden):
            w = refs[1 + 2 * i][...]          # (out_i, in_i), compute dtype
            b = refs[2 + 2 * i][...]          # (out_i, 1),    f32
            y = jnp.dot(w, h, preferred_element_type=jnp.float32)  # (out_i, tile_b)
            h = jnp.maximum(y + b, 0.0).astype(compute_dtype)       # f32 bias+ReLU

        # Single fused head matmul: rows [0, action_dim) = mu, rest = std.
        heads = jnp.dot(w_head_ref[...], h,
                        preferred_element_type=jnp.float32) + b_head_ref[...]

        # Branch-free row select. The slab is only 2*action_dim sublanes tall, so
        # computing both branches costs the same number of EUP vregs as slicing.
        row = jax.lax.broadcasted_iota(jnp.int32, heads.shape, dimension=0)
        mean_vals = 2.0 * jnp.tanh(heads)
        std_vals = _softplus(heads) + 1e-5
        out_ref[...] = jnp.where(row < action_dim, mean_vals, std_vals).astype(out_ref.dtype)

    return kernel


def policy_net_forward(x, params, *, target_tile_b=4096,
                       compute_dtype=jnp.bfloat16, out_dtype=jnp.float32):
    """x: (batch, state_dim) f32.  params: (in,out) weights and (1,out) biases.

    Returns (mean, std), each (batch, action_dim) in out_dtype.
    """
    batch, state_dim = x.shape
    num_hidden = sum(1 for k in params if k.startswith("w") and k[1:].isdigit())
    action_dim = params["wmu"].shape[1]
    head_out = 2 * action_dim

    # --- Weights: transpose to (out, in), fuse mu/std heads, cast once. ---------
    ws = [params[f"w{i}"].T.astype(compute_dtype) for i in range(num_hidden)]
    bs = [params[f"b{i}"].reshape(-1, 1).astype(jnp.float32) for i in range(num_hidden)]
    w_head = jnp.concatenate([params["wmu"], params["wstd"]], axis=1).T.astype(compute_dtype)
    b_head = jnp.concatenate([params["bmu"], params["bstd"]], axis=1).reshape(-1, 1).astype(jnp.float32)

    # --- Batch tiling: batch maps to lanes, tile_b is a multiple of 128. --------
    padded = _round_up(batch, _LANE)
    tile_target = max(_LANE, _round_up(min(target_tile_b, padded), _LANE))
    n_steps = pl.cdiv(padded, tile_target)
    if n_steps == 1 and padded >= 2 * _LANE:
        n_steps = 2  # keep both v7x TensorCores busy; ~free on v5e/v6e
    tile_b = _round_up(pl.cdiv(padded, n_steps), _LANE)
    padded = tile_b * n_steps
    grid = (n_steps,)

    # Pad + transpose + cast in one expression -> one fused XLA layout pass on x.
    if padded != batch:
        x_t = jnp.pad(x, ((0, padded - batch), (0, 0))).T.astype(compute_dtype)
    else:
        x_t = x.T.astype(compute_dtype)

    args = [x_t]
    in_specs = [pl.BlockSpec((state_dim, tile_b), lambda i: (0, i))]
    for li in range(num_hidden):
        args += [ws[li], bs[li]]
        # Full blocks, constant block index -> weights stay resident in VMEM.
        in_specs += [
            pl.BlockSpec(ws[li].shape, lambda i: (0, 0)),
            pl.BlockSpec(bs[li].shape, lambda i: (0, 0)),
        ]
    args += [w_head, b_head]
    in_specs += [
        pl.BlockSpec(w_head.shape, lambda i: (0, 0)),
        pl.BlockSpec(b_head.shape, lambda i: (0, 0)),
    ]

    out_t = pl.pallas_call(
        _make_policy_kernel(num_hidden, action_dim, compute_dtype),
        out_shape=jax.ShapeDtypeStruct((head_out, padded), out_dtype),
        grid=grid,
        in_specs=in_specs,
        out_specs=pl.BlockSpec((head_out, tile_b), lambda i: (0, i)),
        compiler_params=pltpu.CompilerParams(dimension_semantics=("parallel",)),
    )(*args)

    y = out_t[:, :batch].T  # (batch, 2*action_dim); tiny layout op
    return y[:, :action_dim], y[:, action_dim:]


def init_params(key, state_dim, hidden_layers_dim, action_dim):
    """Deterministic synthetic init mirroring nn.Linear shapes (stored as (in, out))."""
    dims = [state_dim] + list(hidden_layers_dim)
    keys = jax.random.split(key, 2 * len(hidden_layers_dim) + 4)
    params = {}
    ki = 0
    for idx in range(len(hidden_layers_dim)):
        fan_in, fan_out = dims[idx], dims[idx + 1]
        bound = 1.0 / (fan_in ** 0.5)
        params[f"w{idx}"] = jax.random.uniform(
            keys[ki], (fan_in, fan_out), jnp.float32, -bound, bound); ki += 1
        params[f"b{idx}"] = jax.random.uniform(
            keys[ki], (1, fan_out), jnp.float32, -bound, bound); ki += 1
    fan_in = hidden_layers_dim[-1]
    bound = 1.0 / (fan_in ** 0.5)
    params["wmu"] = jax.random.uniform(
        keys[ki], (fan_in, action_dim), jnp.float32, -bound, bound); ki += 1
    params["bmu"] = jax.random.uniform(
        keys[ki], (1, action_dim), jnp.float32, -bound, bound); ki += 1
    params["wstd"] = jax.random.uniform(
        keys[ki], (fan_in, action_dim), jnp.float32, -bound, bound); ki += 1
    params["bstd"] = jax.random.uniform(
        keys[ki], (1, action_dim), jnp.float32, -bound, bound); ki += 1
    return params


def reference_forward(x, params):
    num_hidden = sum(1 for k in params if k.startswith("w") and k[1:].isdigit())
    h = x
    for i in range(num_hidden):
        h = jnp.maximum(h @ params[f"w{i}"] + params[f"b{i}"], 0.0)
    mean = 2.0 * jnp.tanh(h @ params["wmu"] + params["bmu"])
    std = jax.nn.softplus(h @ params["wstd"] + params["bstd"]) + 1e-5
    return mean, std


if __name__ == "__main__":
    state_dim = 16
    hidden_layers_dim = [32, 32]
    action_dim = 4

    key = jax.random.PRNGKey(0)
    kx, kp, kx2 = jax.random.split(key, 3)
    params = init_params(kp, state_dim, hidden_layers_dim, action_dim)

    # Case 1: small batch, f32 matmul operands (near-exact parity with reference).
    batch = 8
    x = jax.random.normal(kx, (batch, state_dim), jnp.float32)
    mean, std = policy_net_forward(x, params, compute_dtype=jnp.float32)
    jax.block_until_ready((mean, std))
    mean_ref, std_ref = reference_forward(x, params)
    assert mean.shape == (batch, action_dim) and std.shape == (batch, action_dim)
    assert jnp.allclose(mean, mean_ref, atol=1e-4, rtol=1e-4)
    assert jnp.allclose(std, std_ref, atol=1e-4, rtol=1e-4)
    assert bool(jnp.all(std > 0.0))

    # Case 2: batch not a multiple of 128 (exercises lane padding + multi-step
    # tiling logic), bf16 MXU operands with f32 accumulation / epilogue.
    batch2 = 100
    x2 = jax.random.normal(kx2, (batch2, state_dim), jnp.float32)
    mean2, std2 = policy_net_forward(x2, params, target_tile_b=64,
                                     compute_dtype=jnp.bfloat16)
    jax.block_until_ready((mean2, std2))
    mean2_ref, std2_ref = reference_forward(x2, params)
    assert mean2.shape == (batch2, action_dim) and std2.shape == (batch2, action_dim)
    assert jnp.allclose(mean2, mean2_ref, atol=5e-2, rtol=5e-2)
    assert jnp.allclose(std2, std2_ref, atol=5e-2, rtol=5e-2)
    assert bool(jnp.all(std2 > 0.0))

    print("KERNEL_OK")
</pallas_src>

<mosaic_0001>
module attributes {stable_mosaic.version = 11 : i64} {
  func.func @kernel(%arg0: i32, %arg1: memref<16x128xf32, #tpu.memory_space<vmem>>, %arg2: memref<32x16xf32, #tpu.memory_space<vmem>>, %arg3: memref<32x1xf32, #tpu.memory_space<vmem>>, %arg4: memref<32x32xf32, #tpu.memory_space<vmem>>, %arg5: memref<32x1xf32, #tpu.memory_space<vmem>>, %arg6: memref<8x32xf32, #tpu.memory_space<vmem>>, %arg7: memref<8x1xf32, #tpu.memory_space<vmem>>, %arg8: memref<8x128xf32, #tpu.memory_space<vmem>>) attributes {dimension_semantics = [#tpu.dimension_semantics<parallel>], iteration_bounds = array<i64: 1>, scalar_prefetch = 0 : i64, scratch_operands = 0 : i64, tpu.core_type = #tpu.core_type<tc>, window_params = [{transform_indices = @transform_0, window_bounds = array<i64: 16, 128>}, {pipeline_mode = #tpu.pipeline_mode<synchronous>, transform_indices = @transform_1, window_bounds = array<i64: 32, 16>}, {pipeline_mode = #tpu.pipeline_mode<synchronous>, transform_indices = @transform_2, window_bounds = array<i64: 32, 1>}, {pipeline_mode = #tpu.pipeline_mode<synchronous>, transform_indices = @transform_3, window_bounds = array<i64: 32, 32>}, {pipeline_mode = #tpu.pipeline_mode<synchronous>, transform_indices = @transform_4, window_bounds = array<i64: 32, 1>}, {pipeline_mode = #tpu.pipeline_mode<synchronous>, transform_indices = @transform_5, window_bounds = array<i64: 8, 32>}, {pipeline_mode = #tpu.pipeline_mode<synchronous>, transform_indices = @transform_6, window_bounds = array<i64: 8, 1>}, {transform_indices = @transform_7, window_bounds = array<i64: 8, 128>}]} {
    %c0 = arith.constant 0 : index
    %c0_0 = arith.constant 0 : index
    %0 = vector.load %arg1[%c0, %c0_0] : memref<16x128xf32, #tpu.memory_space<vmem>>, vector<16x128xf32>
    %c0_1 = arith.constant 0 : index
    %c0_2 = arith.constant 0 : index
    %1 = vector.load %arg2[%c0_1, %c0_2] : memref<32x16xf32, #tpu.memory_space<vmem>>, vector<32x16xf32>
    %c0_3 = arith.constant 0 : index
    %c0_4 = arith.constant 0 : index
    %2 = vector.load %arg3[%c0_3, %c0_4] : memref<32x1xf32, #tpu.memory_space<vmem>>, vector<32x1xf32>
    %cst = arith.constant dense<0.000000e+00> : vector<32x128xf32>
    %3 = tpu.matmul %1, %0, %cst {dimension_numbers = #tpu.dot_dimension_numbers<[1], [0], [0], [1], [0, 0, 1, 1], [], []>} : vector<32x16xf32>, vector<16x128xf32>, vector<32x128xf32> -> vector<32x128xf32>
    %4 = vector.broadcast %2 : vector<32x1xf32> to vector<32x128xf32>
    %5 = arith.addf %3, %4 : vector<32x128xf32>
    %cst_5 = arith.constant 0.000000e+00 : f32
    %6 = vector.broadcast %cst_5 : f32 to vector<32x128xf32>
    %7 = arith.maximumf %5, %6 : vector<32x128xf32>
    %c0_6 = arith.constant 0 : index
    %c0_7 = arith.constant 0 : index
    %8 = vector.load %arg4[%c0_6, %c0_7] : memref<32x32xf32, #tpu.memory_space<vmem>>, vector<32x32xf32>
    %c0_8 = arith.constant 0 : index
    %c0_9 = arith.constant 0 : index
    %9 = vector.load %arg5[%c0_8, %c0_9] : memref<32x1xf32, #tpu.memory_space<vmem>>, vector<32x1xf32>
    %cst_10 = arith.constant dense<0.000000e+00> : vector<32x128xf32>
    %10 = tpu.matmul %8, %7, %cst_10 {dimension_numbers = #tpu.dot_dimension_numbers<[1], [0], [0], [1], [0, 0, 1, 1], [], []>} : vector<32x32xf32>, vector<32x128xf32>, vector<32x128xf32> -> vector<32x128xf32>
    %11 = vector.broadcast %9 : vector<32x1xf32> to vector<32x128xf32>
    %12 = arith.addf %10, %11 : vector<32x128xf32>
    %cst_11 = arith.constant 0.000000e+00 : f32
    %13 = vector.broadcast %cst_11 : f32 to vector<32x128xf32>
    %14 = arith.maximumf %12, %13 : vector<32x128xf32>
    %c0_12 = arith.constant 0 : index
    %c0_13 = arith.constant 0 : index
    %15 = vector.load %arg6[%c0_12, %c0_13] : memref<8x32xf32, #tpu.memory_space<vmem>>, vector<8x32xf32>
    %cst_14 = arith.constant dense<0.000000e+00> : vector<8x128xf32>
    %16 = tpu.matmul %15, %14, %cst_14 {dimension_numbers = #tpu.dot_dimension_numbers<[1], [0], [0], [1], [0, 0, 1, 1], [], []>} : vector<8x32xf32>, vector<32x128xf32>, vector<8x128xf32> -> vector<8x128xf32>
    %c0_15 = arith.constant 0 : index
    %c0_16 = arith.constant 0 : index
    %17 = vector.load %arg7[%c0_15, %c0_16] : memref<8x1xf32, #tpu.memory_space<vmem>>, vector<8x1xf32>
    %18 = vector.broadcast %17 : vector<8x1xf32> to vector<8x128xf32>
    %19 = arith.addf %16, %18 : vector<8x128xf32>
    %20 = tpu.iota {dimensions = array<i32: 0>} : vector<8x128xi32>
    %21 = math.tanh %19 : vector<8x128xf32>
    %cst_17 = arith.constant 2.000000e+00 : f32
    %22 = vector.broadcast %cst_17 : f32 to vector<8x128xf32>
    %23 = arith.mulf %22, %21 : vector<8x128xf32>
    %cst_18 = arith.constant 0.000000e+00 : f32
    %24 = vector.broadcast %cst_18 : f32 to vector<8x128xf32>
    %25 = arith.maximumf %19, %24 : vector<8x128xf32>
    %26 = math.absf %19 : vector<8x128xf32>
    %cst_19 = arith.constant 0.000000e+00 : f32
    %27 = vector.broadcast %cst_19 : f32 to vector<8x128xf32>
    %28 = arith.subf %27, %26 : vector<8x128xf32>
    %29 = math.exp %28 : vector<8x128xf32>
    %30 = math.log1p %29 : vector<8x128xf32>
    %31 = arith.addf %25, %30 : vector<8x128xf32>
    %cst_20 = arith.constant 9.99999974E-6 : f32
    %32 = vector.broadcast %cst_20 : f32 to vector<8x128xf32>
    %33 = arith.addf %31, %32 : vector<8x128xf32>
    %c4_i32 = arith.constant 4 : i32
    %34 = vector.broadcast %c4_i32 : i32 to vector<8x128xi32>
    %35 = arith.cmpi slt, %20, %34 : vector<8x128xi32>
    %36 = arith.select %35, %23, %33 : vector<8x128xi1>, vector<8x128xf32>
    %c0_21 = arith.constant 0 : index
    %c0_22 = arith.constant 0 : index
    %37 = vector.load %arg8[%c0_21, %c0_22] : memref<8x128xf32, #tpu.memory_space<vmem>>, vector<8x128xf32>
    tpu.vector_store %arg8[%c0_21, %c0_22], %36 {strides = array<i32>} : memref<8x128xf32, #tpu.memory_space<vmem>>, vector<8x128xf32>,
    return
  }
  func.func @transform_0(%arg0: i32) -> (i32, i32) {
    %c0_i32 = arith.constant 0 : i32
    %c0_i32_0 = arith.constant 0 : i32
    return %c0_i32, %arg0 : i32, i32
  }
  func.func @transform_1(%arg0: i32) -> (i32, i32) {
    %c0_i32 = arith.constant 0 : i32
    %c0_i32_0 = arith.constant 0 : i32
    %c0_i32_1 = arith.constant 0 : i32
    return %c0_i32, %c0_i32_0 : i32, i32
  }
  func.func @transform_2(%arg0: i32) -> (i32, i32) {
    %c0_i32 = arith.constant 0 : i32
    %c0_i32_0 = arith.constant 0 : i32
    %c0_i32_1 = arith.constant 0 : i32
    return %c0_i32, %c0_i32_0 : i32, i32
  }
  func.func @transform_3(%arg0: i32) -> (i32, i32) {
    %c0_i32 = arith.constant 0 : i32
    %c0_i32_0 = arith.constant 0 : i32
    %c0_i32_1 = arith.constant 0 : i32
    return %c0_i32, %c0_i32_0 : i32, i32
  }
  func.func @transform_4(%arg0: i32) -> (i32, i32) {
    %c0_i32 = arith.constant 0 : i32
    %c0_i32_0 = arith.constant 0 : i32
    %c0_i32_1 = arith.constant 0 : i32
    return %c0_i32, %c0_i32_0 : i32, i32
  }
  func.func @transform_5(%arg0: i32) -> (i32, i32) {
    %c0_i32 = arith.constant 0 : i32
    %c0_i32_0 = arith.constant 0 : i32
    %c0_i32_1 = arith.constant 0 : i32
    return %c0_i32, %c0_i32_0 : i32, i32
  }
  func.func @transform_6(%arg0: i32) -> (i32, i32) {
    %c0_i32 = arith.constant 0 : i32
    %c0_i32_0 = arith.constant 0 : i32
    %c0_i32_1 = arith.constant 0 : i32
    return %c0_i32, %c0_i32_0 : i32, i32
  }
  func.func @transform_7(%arg0: i32) -> (i32, i32) {
    %c0_i32 = arith.constant 0 : i32
    %c0_i32_0 = arith.constant 0 : i32
    return %c0_i32, %arg0 : i32, i32
  }
}

</mosaic_0001>

<bundles_post_ra>
// kernel: tpu_custom_call.1
= control target key start
LH: loop header
LB: loop body
LE: loop exit
PB: predicated region body
PF: predicated region fallthrough
CT: control target
= control target key end

     0   :  { %vm57_vm0 = vcmask 130048   ;;  %v524_v4 = vmov 0   ;;  %s650_s0 = inlined_call_operand.vmem [shape: f32[16,128], index: 0, kind: input, shape index: {}]   ;;  %s651_s1 = inlined_call_operand.vmem [shape: f32[32,16], index: 1, kind: input, shape index: {}]   ;;  %s652_s2 = inlined_call_operand.vmem [shape: f32[32,1], index: 2, kind: input, shape index: {}]   ;;  %s653_s3 = inlined_call_operand.vmem [shape: f32[32,32], index: 3, kind: input, shape index: {}]   ;;  %s654_s4 = inlined_call_operand.vmem [shape: f32[32,1], index: 4, kind: input, shape index: {}]   ;;  %s655_s5 = inlined_call_operand.vmem [shape: f32[8,32], index: 5, kind: input, shape index: {}]   ;;  %s656_s6 = inlined_call_operand.vmem [shape: f32[8,1], index: 6, kind: input, shape index: {}]   ;;  %s657_s7 = inlined_call_operand.hbm [shape: f32[8,128], index: 7, kind: output, shape index: {}]  }
   0x1   :  { %v27_v0 = vld [vmem:[%s650_s0] sm:$0xff]  ;;  %v28_v1 = vld [vmem:[%s650_s0 + $0x8] sm:$0xff]  ;;  %492 = vset.pattern.permute.xlu0 %v524_v4  ;;  %493 = vset.pattern.permute.xlu1 %v524_v4  ;;  %v35_v6 = vld [vmem:[%s652_s2 + $0x10] sm:$0xff] }
   0x2   :  { %v29_v2 = vld [vmem:[%s651_s1] sm:$0xff]  ;;  %v469_v3 = vpack.c.bf16 %v28_v1, %v27_v0  ;;  %v30_v7 = vld [vmem:[%s651_s1 + $0x8] sm:$0xff]  ;;  %49 = vperm.xlu1 %493, %v35_v6   ;;  %v31_v9 = vld [vmem:[%s651_s1 + $0x10] sm:$0xff] }
   0x3   :  { %438 = vmatprep.mubr.msk.f32.mxu0 %vm57_vm0, %v29_v2  ;;  %v33_v5 = vld [vmem:[%s652_s2] sm:$0xff]  ;;  %v34_v8 = vld [vmem:[%s652_s2 + $0x8] sm:$0xff]  ;;  %v36_v10 = vld [vmem:[%s652_s2 + $0x18] sm:$0xff] }
   0x4   :  { %470 = vmatprep.subr.bf16.mxu0 %v469_v3  ;;  %39 = vperm.xlu0 %492, %v33_v5  }
   0x5   :  { %472 = vmatpush3.bf16.msra.mxu0 %v469_v3 }
   0x6   :  { %12 = vsyncpa [#allocation3], 0  ;;  %v32_v11 = vld [vmem:[%s651_s1 + $0x18] sm:$0xff]  ;;  %v163_v12 = vld [vmem:[%s654_s4] sm:$0xff]  ;;  %54 = vperm.xlu1 %493, %v36_v10   ;;  %vm187_vm1 = vcmask 261120   ;;  %v525_v39 = vmov 0.0|0.0   ;;  %v369_v6 = vlaneseq }
   0x7   :  { %v164_v13 = vld [vmem:[%s654_s4 + $0x8] sm:$0xff]  ;;  %v165_v14 = vld [vmem:[%s654_s4 + $0x10] sm:$0xff]  ;;  %v166_v15 = vld [vmem:[%s654_s4 + $0x18] sm:$0xff]  ;;  %481 = vmatprep.subr.bf16.mxu0 %v525_v39  ;;  %vm526_vm2 = vmmov 0   ;;  %v527_v40 = vmov 0.0  }
   0x8   :  { %439 = vmatmul.mubr.msk.f32.vlgmr.msra.gmra.mrb[0].mxu0 %vm57_vm0, %v30_v7  ;;  %44 = vperm.xlu0 %492, %v34_v8   ;;  %v290_v16 = vld [vmem:[%s656_s6] sm:$0xff]  ;;  %v160_v36 = vld [vmem:[%s653_s3 + $0x8] sm:$0xff]  ;;  %v161_v37 = vld [vmem:[%s653_s3 + $0x10] sm:$0xff]  ;;  %v370_v10 = vshrl.u32 %v369_v6, 7 }
   0x9   :  { %441 = vmatprep.mubr.msk.f32.mxu0 %vm57_vm0, %v31_v9  ;;  %v159_v17 = vld [vmem:[%s653_s3] sm:$0xff]  ;;  %v162_v38 = vld [vmem:[%s653_s3 + $0x18] sm:$0xff] }
   0xa   :  { %174 = vperm.xlu1 %493, %v164_v13   ;;  %452 = vmatprep.mubr.msk.f32.mxu1 %vm187_vm1, %v159_v17  ;;  %v289_v59 = vld [vmem:[%s655_s5] sm:$0xff]  ;;  %s528_s5 = smov [#allocation2]   ;;  %vm389_vm4 = vcmp.lt.s32.totalorder %v370_v10, 4 }
   0xb   :  { %s398_s11 = sshll.u32 %s528_s5, 4  ;;  %s399_s11 = int_to_ptr.vmem [resolvable:$true] %s398_s11 }
   0xc   :  { %442 = vmatmul.mubr.msk.f32.gmra.mrb[2].mxu0 %vm57_vm0, %v32_v11  ;;  %169 = vperm.xlu0 %492, %v163_v12   ;;  %s500_s12 = scalar_lea.vmem %s399_s11, 128  ;;  %p505_p1 = scmp.lt.s32.totalorder %s399_s11, %s399_s11 }
   0xd   :  { %466 = vmatprep.mubr.msk.f32.mxu0 %vm526_vm2, %v527_v40  ;;  %p501_p0 = scmp.ne.s32.totalorder %s399_s11, %s500_s12  ;;  %p506_p2 = scmp.lt.s32.totalorder %s500_s12, %s500_s12 }
   0xe   :  { %184 = vperm.xlu1 %493, %v166_v15  }
   0xf   :  { %p507_p3 = por %p506_p2, %p505_p1 }
  0x10   :  { %179 = vperm.xlu0 %492, %v165_v14  }
  0x11   :  { %p508_p4 = pnand %p507_p3, %p501_p0 }
  0x14   :  { %293 = vperm.xlu0 %492, %v290_v16  }
  0x81   :  { %v50_v19 = vpop.permute.xlu1 %49 }
  0x83   :  { %v40_v18 = vpop.permute.xlu0 %39 }
  0x85   :  { %v55_v26 = vpop.permute.xlu1 %54 }
  0x87   :  { %v45_v20 = vpop.permute.xlu0 %44 }
  0x89   :  { %v175_v41 = vpop.permute.xlu1 %174 }
  0x8b   :  { %v170_v42 = vpop.permute.xlu0 %169 }
  0x8d   :  { %v185_v48 = vpop.permute.xlu1 %184 }
  0x8f   :  { %v180_v51 = vpop.permute.xlu0 %179 }
  0x93   :  { %v294_v60 = vpop.permute.xlu0 %293 }
  0xdb   :  { %v440_v21 = vpop.f32.mrb[0].mxu0 }
  0xdc   :  { %v142_v22 = vadd.f32 %v440_v21, %v45_v20  ;;  %v136_v23 = vpop.f32.mrb[1].mxu0 }
  0xdd   :  { %v137_v24 = vadd.f32 %v136_v23, %v40_v18 }
  0xde   :  { %v156_v25 = vmax.f32 %v142_v22, 0.0 }
  0xdf   :  { %v155_v27 = vmax.f32 %v137_v24, 0.0  ;;  %v443_v28 = vpop.f32.mrb[2].mxu0 }
  0xe0   :  { %v152_v29 = vadd.f32 %v443_v28, %v55_v26  ;;  %v146_v30 = vpop.f32.mrb[3].mxu0 }
  0xe1   :  { %v147_v31 = vadd.f32 %v146_v30, %v50_v19  ;;  %v473_v32 = vpack.c.bf16 %v156_v25, %v155_v27 }
  0xe2   :  { %v158_v33 = vmax.f32 %v152_v29, 0.0 }
  0xe3   :  { %v157_v34 = vmax.f32 %v147_v31, 0.0  ;;  %474 = vmatprep.subr.bf16.mxu1 %v473_v32 }
  0xe4   :  { %476 = vmatpush3.bf16.msra.mxu1 %v473_v32 }
  0xe5   :  { %v477_v35 = vpack.c.bf16 %v158_v33, %v157_v34 }
  0xe7   :  { %478 = vmatprep.subr.bf16.mxu1 %v477_v35 }
  0xe8   :  { %480 = vmatpush3.bf16.msra.mxu1 %v477_v35 }
  0xeb   :  { %453 = vmatmul.mubr.msk.f32.vlgmr.msra.gmra.mrb[0].mxu1 %vm187_vm1, %v160_v36 }
  0xec   :  { %455 = vmatprep.mubr.msk.f32.mxu1 %vm187_vm1, %v161_v37 }
  0xef   :  { %456 = vmatmul.mubr.msk.f32.gmra.mrb[2].mxu1 %vm187_vm1, %v162_v38 }
 0x1be   :  { %v454_v43 = vpop.f32.mrb[0].mxu1 }
 0x1bf   :  { %v272_v44 = vadd.f32 %v454_v43, %v175_v41  ;;  %v266_v45 = vpop.f32.mrb[1].mxu1 }
 0x1c0   :  { %v267_v46 = vadd.f32 %v266_v45, %v170_v42 }
 0x1c1   :  { %v286_v47 = vmax.f32 %v272_v44, 0.0 }
 0x1c2   :  { %v285_v49 = vmax.f32 %v267_v46, 0.0  ;;  %v457_v50 = vpop.f32.mrb[2].mxu1 }
 0x1c3   :  { %v282_v52 = vadd.f32 %v457_v50, %v185_v48  ;;  %v276_v53 = vpop.f32.mrb[3].mxu1 }
 0x1c4   :  { %v482_v54 = vpack.c.bf16 %v286_v47, %v285_v49  ;;  %v277_v55 = vadd.f32 %v276_v53, %v180_v51 }
 0x1c5   :  { %v288_v56 = vmax.f32 %v282_v52, 0.0 }
 0x1c6   :  { %v287_v57 = vmax.f32 %v277_v55, 0.0  ;;  %483 = vmatpush3.bf16.msra.mxu0 %v482_v54 }
 0x1c7   :  { %484 = vmatprep.subr.bf16.mxu0 %v525_v39 }
 0x1c8   :  { %v485_v58 = vpack.c.bf16 %v288_v56, %v287_v57 }
 0x1ca   :  { %486 = vmatpush3.bf16.msra.mxu0 %v485_v58 }
 0x1cd   :  { %467 = vmatmul.mubr.msk.f32.vlgmr.msra.gmra.mrb[4].mxu0 %vm187_vm1, %v289_v59 }
 0x2a0   :  { %v365_v61 = vpop.f32.mrb[4].mxu0 }
 0x2a1   :  { %v366_v62 = vadd.f32 %v365_v61, %v294_v60  ;;  %v468_v63 = vpop.f32.mrb[5].mxu0 }
 0x2a3   :  { %v374_v0 = vand.u32 2147483647, %v366_v62  ;;  %v373_v13 = vmax.f32 %v366_v62, 0.0 }
 0x2a5   :  { %v375_v1 = vsub.f32 0.0, %v374_v0 }
 0x2a7   :  { %v376_v2 = vmul.f32 1.442695, %v375_v1 }
 0x2a9   :  { %494 = vpow2.f32 %v376_v2 }
 0x2b3   :  { %v495_v3 = vpop.eup %494 }
 0x2b4   :  { %v378_v4 = vadd.f32 1.0, %v495_v3  ;;  %v381_v5 = vmul.f32 -0.5, %v495_v3  ;;  %v384_v8 = vand.u32 2147483647, %v495_v3 }
 0x2b6   :  { %496 = vlog2.f32 %v378_v4  ;;  %v382_v7 = vadd.f32 1.0, %v381_v5  ;;  %vm385_vm3 = vcmp.lt.f32.partialorder %v384_v8, 0.0004427343 }
 0x2b7   :  { %498 = vtanh.f32 %v366_v62 }
 0x2b8   :  { %v383_v12 = vmul.f32 %v495_v3, %v382_v7 }
 0x2c0   :  { %v497_v9 = vpop.eup %496 }
 0x2c1   :  { %v380_v11 = vmul.f32 0.6931472, %v497_v9  ;;  %v499_v14 = vpop.eup %498 }
 0x2c2   :  { %v372_v17 = vmul.f32 2.0, %v499_v14 }
 0x2c3   :  { %v386_v15 = vsel %vm385_vm3, %v383_v12, %v380_v11 }
 0x2c4   :  { %v387_v16 = vadd.f32 %v386_v15, %v373_v13 }
 0x2c6   :  { %v388_v18 = vadd.f32 1e-05, %v387_v16 }
 0x2c8   :  { %v390_v19 = vsel %vm389_vm4, %v372_v17, %v388_v18 }
 0x2c9   :  { %391 = vst [vmem:[#allocation2] sm:$0xff] %v390_v19 }
 0x2ca   :  { %511 = shalt.err (!%p508_p4)
}
 0x2cb   :  { %s512_s15 = scalar_lea.hbm %s657_s7, 128 }
 0x2cc   :  { %p513_p5 = scmp.ne.s32.totalorder %s657_s7, %s512_s15  ;;  %p516_p6 = scmp.lt.u32.totalorder %s512_s15, %s657_s7 }
 0x2ce   :  { %p518_p7 = pnand %p516_p6, %p513_p5 }
 0x2d0   :  { %521 = shalt.err (!%p518_p7)
}
 0x2d1   :  { %401 = dma.vmem_to_hbm [thread:$0]  %s399_s11, 128, %s657_s7, [#allocation3]  }
 0x2d2   :  { %522 = dma.done.wait [#allocation3], 128  }
 0x2d3   :  { %523 = vsyncadd [#allocation3], 4294967168 }
 0x2d4   :  { %405 = vsyncpa [#allocation3], 1 }

</bundles_post_ra>
